<compile_context>
chip_gen: v6e
topology: v6e:2x2x1
jax: 0.10.0
libtpu: 0.0.40
codegen_flags: <defaults>
</compile_context>

<pallas_src>
import jax
import jax.numpy as jnp
from jax import lax
from jax.experimental import pallas as pl
from jax.experimental.pallas import tpu as pltpu


_CHUNK = 256          # rows processed per inner-loop step (multiple of 8 sublanes)
_LEAKY_SLOPE = 0.01   # F.leaky_relu default negative_slope

# Probe for pipeline_mode support (single-buffer the VMEM-resident weights).
try:
    _RESIDENT_KW = dict(pipeline_mode=pl.Buffered(1))
    pl.BlockSpec((8, 128), lambda i: (0, 0), **_RESIDENT_KW)
except Exception:  # older jax without pipeline_mode / Buffered
    _RESIDENT_KW = {}


def _round_up(n, m):
    return ((n + m - 1) // m) * m


def _round_down(n, m):
    return (n // m) * m


def _make_kernel(chunk, n_chunks, compute_dtype):
    def kernel(x_ref, w1_ref, b1_ref, w2_ref, b2_ref, o_ref):
        w1 = w1_ref[...]            # [D, H], VMEM-resident
        b1 = b1_ref[...]            # [1, H] f32
        w2 = w2_ref[...]            # [1, H] f32 (PyTorch fc2.weight layout)
        b2 = b2_ref[0, 0]           # scalar f32 (SMEM)

        def do_rows(r0):
            xs = x_ref[pl.ds(r0, chunk), :]
            if compute_dtype is not None and xs.dtype != compute_dtype:
                # In-kernel cast: costs VPU cycles, not an extra HBM pass over x.
                xs = xs.astype(compute_dtype)
            # fc1 on the MXU, f32 accumulation.
            h = jnp.dot(xs, w1, preferred_element_type=jnp.float32) + b1
            # leaky_relu(negative_slope=0.01): mul + max.
            h = jnp.maximum(h, _LEAKY_SLOPE * h)
            # fc2 (out_features=1): VPU multiply + XLU lane reduce (no N=1 matmul).
            a = jnp.sum(h * w2, axis=-1, keepdims=True) + b2
            o_ref[pl.ds(r0, chunk), :] = a.astype(o_ref.dtype)

        if n_chunks == 1:
            do_rows(0)
        else:
            def body(c, carry):
                do_rows(pl.multiple_of(c * chunk, chunk))
                return carry
            lax.fori_loop(0, n_chunks, body, 0,
                          unroll=True if n_chunks <= 8 else 8)

    return kernel


def wecopy_forward(x, w1, b1, w2_row, b2, *, tile_b=2048, compute_dtype=None):
    """WeCopy forward: leaky_relu(x @ w1 + b1) @ w2_row.T + b2  ->  [B, 1].

    x: [B, D]; w1: [D, H] (fc1.weight transposed); b1: [1, H];
    w2_row: [1, H] (fc2.weight, PyTorch layout); b2: [1, 1].

    compute_dtype=None keeps the matmul in x's dtype (f32 parity with PyTorch).
    compute_dtype=jnp.bfloat16 casts x inside the kernel (and w1 once in the
    wrapper) before the MXU dot — faster MXU path, ~1e-3 relative precision loss.
    """
    B, D = x.shape
    H = w1.shape[1]

    # Only the small, one-shot resident weight gets a wrapper-side cast; x does not.
    w1_c = w1 if compute_dtype is None else w1.astype(compute_dtype)
    b1_f = b1.astype(jnp.float32)
    w2_f = w2_row.astype(jnp.float32)
    b2_f = b2.astype(jnp.float32)

    x_item = jnp.dtype(x.dtype).itemsize
    w1_item = jnp.dtype(w1_c.dtype).itemsize

    # ---- VMEM-aware batch-tile derivation ---------------------------------
    try:
        vmem_cap = int(pltpu.get_tpu_info().vmem_capacity_bytes)
    except Exception:
        vmem_cap = 64 * 1024 * 1024          # conservative default (v7x per-TC)
    budget = int(vmem_cap * 0.75)
    # Resident tensors (accounted with double buffers defensively) + chunk temps + slack.
    resident = (2 * D * H * w1_item + 4 * H * 4
                + 3 * _CHUNK * max(H, 128) * 4 + (2 << 20))
    per_row = 2 * D * x_item + 2 * 4         # double-buffered x block + f32 out block
    vmem_rows = max(8, (budget - resident) // per_row)

    tile_b = min(int(tile_b), int(vmem_rows),
                 _round_up(pl.cdiv(B, 2), 8),   # >= 2 grid steps -> megacore on v7x
                 _round_up(B, 8))
    tile_b = max(8, _round_down(tile_b, 8))
    if tile_b > _CHUNK:
        tile_b = _round_down(tile_b, _CHUNK)    # whole number of inner chunks
    chunk = min(_CHUNK, tile_b)
    n_chunks = tile_b // chunk
    grid = (pl.cdiv(B, tile_b),)
    # TODO(synk): add a K-tiled (grid over D) fallback with an f32 accumulator for
    # very large input_dim*hidden_dim where w1 alone would not fit VMEM.

    need = resident + per_row * tile_b
    vmem_limit = int(min(int(vmem_cap * 0.9), max(need + (8 << 20), 32 << 20)))

    cost = pl.CostEstimate(
        flops=2 * B * D * H + 4 * B * H,
        transcendentals=0,
        bytes_accessed=B * D * x_item + D * H * w1_item + 8 * H + 4 + 4 * B,
    )

    return pl.pallas_call(
        _make_kernel(chunk, n_chunks, compute_dtype),
        out_shape=jax.ShapeDtypeStruct((B, 1), jnp.float32),
        grid=grid,
        in_specs=[
            pl.BlockSpec((tile_b, D), lambda i: (i, 0)),                # x: streamed tiles
            pl.BlockSpec((D, H), lambda i: (0, 0), **_RESIDENT_KW),     # w1: resident
            pl.BlockSpec((1, H), lambda i: (0, 0), **_RESIDENT_KW),     # b1: resident
            pl.BlockSpec((1, H), lambda i: (0, 0), **_RESIDENT_KW),     # w2 row: resident
            pl.BlockSpec(memory_space=pltpu.MemorySpace.SMEM),          # b2: scalar
        ],
        out_specs=pl.BlockSpec((tile_b, 1), lambda i: (i, 0)),
        compiler_params=pltpu.CompilerParams(
            dimension_semantics=("parallel",),
            vmem_limit_bytes=vmem_limit,
        ),
        cost_estimate=cost,
    )(x, w1_c, b1_f, w2_f, b2_f)


def init_params(key, input_dim, hidden_dim):
    """nn.Linear default init U(-1/sqrt(fan_in), 1/sqrt(fan_in)); w1 stored [in, out]."""
    k1, k2, k3, k4 = jax.random.split(key, 4)
    bound1 = 1.0 / (input_dim ** 0.5)
    bound2 = 1.0 / (hidden_dim ** 0.5)
    w1 = jax.random.uniform(k1, (input_dim, hidden_dim), jnp.float32, -bound1, bound1)
    b1 = jax.random.uniform(k2, (1, hidden_dim), jnp.float32, -bound1, bound1)
    w2 = jax.random.uniform(k3, (1, hidden_dim), jnp.float32, -bound2, bound2)
    b2 = jax.random.uniform(k4, (1, 1), jnp.float32, -bound2, bound2)
    return w1, b1, w2, b2


def reference(x, w1, b1, w2_row, b2):
    h = jnp.dot(x, w1, precision=lax.Precision.HIGHEST) + b1
    h = jnp.where(h > 0, h, _LEAKY_SLOPE * h)
    return jnp.dot(h, w2_row.T, precision=lax.Precision.HIGHEST) + b2


if __name__ == "__main__":
    key = jax.random.PRNGKey(0)
    kx1, kx2, kp = jax.random.split(key, 3)

    input_dim, hidden_dim = 32, 32
    w1, b1, w2, b2 = init_params(kp, input_dim, hidden_dim)

    # 1) small batch: 2 grid steps of 16 rows, partial last tile (f32 parity path).
    x_small = jax.random.normal(kx1, (20, input_dim), jnp.float32)
    out = jax.block_until_ready(wecopy_forward(x_small, w1, b1, w2, b2))
    ref = reference(x_small, w1, b1, w2, b2)
    assert out.shape == (20, 1)
    assert jnp.allclose(out, ref, atol=1e-4, rtol=1e-4), "f32 small-batch mismatch"

    # 2) batch large enough to exercise the in-kernel chunk loop (tile_b=512 -> 2
    #    chunks of 256) plus a partial final grid tile.
    x_big = jax.random.normal(kx2, (1090, input_dim), jnp.float32)
    out_big = jax.block_until_ready(wecopy_forward(x_big, w1, b1, w2, b2))
    ref_big = reference(x_big, w1, b1, w2, b2)
    assert out_big.shape == (1090, 1)
    assert jnp.allclose(out_big, ref_big, atol=1e-4, rtol=1e-4), "f32 chunked mismatch"

    # 3) optional bf16 fast path (in-kernel cast of x; documented precision loss).
    out_bf = jax.block_until_ready(
        wecopy_forward(x_small, w1, b1, w2, b2, compute_dtype=jnp.bfloat16))
    ref_bf = reference(x_small.astype(jnp.bfloat16).astype(jnp.float32),
                       w1.astype(jnp.bfloat16).astype(jnp.float32), b1, w2, b2)
    assert jnp.allclose(out_bf, ref_bf, atol=1e-3, rtol=1e-3), "bf16 mismatch"

    print("KERNEL_OK")
</pallas_src>

<mosaic_0001>
module attributes {stable_mosaic.version = 11 : i64} {
  func.func @kernel(%arg0: i32, %arg1: memref<16x32xf32, #tpu.memory_space<vmem>>, %arg2: memref<32x32xf32, #tpu.memory_space<vmem>>, %arg3: memref<1x32xf32, #tpu.memory_space<vmem>>, %arg4: memref<1x32xf32, #tpu.memory_space<vmem>>, %arg5: memref<1x1xf32, #tpu.memory_space<smem>>, %arg6: memref<16x1xf32, #tpu.memory_space<vmem>>) attributes {dimension_semantics = [#tpu.dimension_semantics<parallel>], iteration_bounds = array<i64: 2>, scalar_prefetch = 0 : i64, scratch_operands = 0 : i64, tpu.core_type = #tpu.core_type<tc>, window_params = [{transform_indices = @transform_0, window_bounds = array<i64: 16, 32>}, {pipeline_mode = #tpu.pipeline_mode<synchronous>, transform_indices = @transform_1, window_bounds = array<i64: 32, 32>}, {pipeline_mode = #tpu.pipeline_mode<synchronous>, transform_indices = @transform_2, window_bounds = array<i64: 1, 32>}, {pipeline_mode = #tpu.pipeline_mode<synchronous>, transform_indices = @transform_3, window_bounds = array<i64: 1, 32>}, {transform_indices = @transform_4, window_bounds = array<i64: 1, 1>}, {transform_indices = @transform_5, window_bounds = array<i64: 16, 1>}]} {
    %c0 = arith.constant 0 : index
    %c0_0 = arith.constant 0 : index
    %0 = vector.load %arg2[%c0, %c0_0] : memref<32x32xf32, #tpu.memory_space<vmem>>, vector<32x32xf32>
    %c0_1 = arith.constant 0 : index
    %c0_2 = arith.constant 0 : index
    %1 = vector.load %arg3[%c0_1, %c0_2] : memref<1x32xf32, #tpu.memory_space<vmem>>, vector<1x32xf32>
    %c0_3 = arith.constant 0 : index
    %c0_4 = arith.constant 0 : index
    %2 = vector.load %arg4[%c0_3, %c0_4] : memref<1x32xf32, #tpu.memory_space<vmem>>, vector<1x32xf32>
    %c0_5 = arith.constant 0 : index
    %c0_6 = arith.constant 0 : index
    %3 = memref.load %arg5[%c0_5, %c0_6] : memref<1x1xf32, #tpu.memory_space<smem>>
    %c0_7 = arith.constant 0 : index
    %c0_8 = arith.constant 0 : index
    %4 = vector.load %arg1[%c0_7, %c0_8] : memref<16x32xf32, #tpu.memory_space<vmem>>, vector<16x32xf32>
    %cst = arith.constant dense<0.000000e+00> : vector<16x32xf32>
    %5 = tpu.matmul %4, %0, %cst {dimension_numbers = #tpu.dot_dimension_numbers<[1], [0], [0], [1], [0, 0, 1, 1], [], []>} : vector<16x32xf32>, vector<32x32xf32>, vector<16x32xf32> -> vector<16x32xf32>
    %6 = vector.broadcast %1 : vector<1x32xf32> to vector<16x32xf32>
    %7 = arith.addf %5, %6 : vector<16x32xf32>
    %cst_9 = arith.constant 0.00999999977 : f32
    %8 = vector.broadcast %cst_9 : f32 to vector<16x32xf32>
    %9 = arith.mulf %8, %7 : vector<16x32xf32>
    %10 = arith.maximumf %7, %9 : vector<16x32xf32>
    %11 = vector.broadcast %2 : vector<1x32xf32> to vector<16x32xf32>
    %12 = arith.mulf %10, %11 : vector<16x32xf32>
    %cst_10 = arith.constant dense<0.000000e+00> : vector<16xf32>
    %13 = vector.multi_reduction <add>, %12, %cst_10 [1] : vector<16x32xf32> to vector<16xf32>
    %14 = vector.shape_cast %13 : vector<16xf32> to vector<16x1xf32>
    %15 = vector.broadcast %3 : f32 to vector<16x1xf32>
    %16 = arith.addf %14, %15 : vector<16x1xf32>
    %c0_11 = arith.constant 0 : index
    %c0_12 = arith.constant 0 : index
    %17 = vector.load %arg6[%c0_11, %c0_12] : memref<16x1xf32, #tpu.memory_space<vmem>>, vector<16x1xf32>
    tpu.vector_store %arg6[%c0_11, %c0_12], %16 {strides = array<i32>} : memref<16x1xf32, #tpu.memory_space<vmem>>, vector<16x1xf32>,
    return
  }
  func.func @transform_0(%arg0: i32) -> (i32, i32) {
    %c0_i32 = arith.constant 0 : i32
    %c0_i32_0 = arith.constant 0 : i32
    return %arg0, %c0_i32 : i32, i32
  }
  func.func @transform_1(%arg0: i32) -> (i32, i32) {
    %c0_i32 = arith.constant 0 : i32
    %c0_i32_0 = arith.constant 0 : i32
    %c0_i32_1 = arith.constant 0 : i32
    return %c0_i32, %c0_i32_0 : i32, i32
  }
  func.func @transform_2(%arg0: i32) -> (i32, i32) {
    %c0_i32 = arith.constant 0 : i32
    %c0_i32_0 = arith.constant 0 : i32
    %c0_i32_1 = arith.constant 0 : i32
    return %c0_i32, %c0_i32_0 : i32, i32
  }
  func.func @transform_3(%arg0: i32) -> (i32, i32) {
    %c0_i32 = arith.constant 0 : i32
    %c0_i32_0 = arith.constant 0 : i32
    %c0_i32_1 = arith.constant 0 : i32
    return %c0_i32, %c0_i32_0 : i32, i32
  }
  func.func @transform_4(%arg0: i32) -> (i32, i32) {
    %c0_i32 = arith.constant 0 : i32
    %c0_i32_0 = arith.constant 0 : i32
    %c0_i32_1 = arith.constant 0 : i32
    return %c0_i32, %c0_i32_0 : i32, i32
  }
  func.func @transform_5(%arg0: i32) -> (i32, i32) {
    %c0_i32 = arith.constant 0 : i32
    %c0_i32_0 = arith.constant 0 : i32
    return %arg0, %c0_i32 : i32, i32
  }
}

</mosaic_0001>

<bundles_post_ra>
// kernel: tpu_custom_call.1
= control target key start
LH: loop header
LB: loop body
LE: loop exit
PB: predicated region body
PF: predicated region fallthrough
CT: control target
= control target key end

     0   :  { %s1177_s0 = inlined_call_operand.hbm [shape: f32[20,32], index: 0, kind: input, shape index: {}]   ;;  %s1178_s1 = inlined_call_operand.hbm [shape: f32[32,32], index: 1, kind: input, shape index: {}]   ;;  %s1179_s2 = inlined_call_operand.vmem [shape: f32[1,32], index: 2, kind: input, shape index: {}]   ;;  %s1180_s3 = inlined_call_operand.vmem [shape: f32[1,32], index: 3, kind: input, shape index: {}]   ;;  %s1181_s4 = inlined_call_operand.<no memory space> [shape: f32[1,1], index: 4, kind: input, shape index: {}]   ;;  %s1182_s5 = inlined_call_operand.vmem [shape: f32[20,1], index: 5, kind: output, shape index: {}]  }
   0x1   :  { %10 = sst [smem:[#allocation2]] %s1181_s4 }
   0x2   :  { %11 = vsyncpa [#allocation4], 0 }
   0x3   :  { %13 = vsyncpa [#allocation4 + $0x1], 0 }
   0x4   :  { %14 = vsyncpa [#allocation6], 0  ;;  %s997_s20 = smov 0   ;;  %s999_s21 = smov 0  }
   0x5   :  { %s1001_s22 = smov 0   ;;  %s1003_s23 = smov 0  }
   0x6 LB: > { %s1016_s4 = sadd.s32 4294967295, %s924_s23   ;;  %s1019_s24 = sadd.s32 1, %s924_s23   ;;  %s924_s23 = sphi %s1003_s23, %s1193_s23   ;;  %s920_s22 = sphi %s1001_s22, %s1192_s22   ;;  %s916_s21 = sphi %s999_s21, %s1191_s21   ;;  %s912_s20 = sphi %s997_s20, %s1190_s20  }
   0x7   : > { %s24_s25 = ssub.s32 %s924_s23, %s1019_s24  ;;  %s27_s26 = sadd.s32 1, %s920_s22 }
   0x8   : > { %p25_p0 = scmp.eq.s32.totalorder %s24_s25, 0  ;;  %p34_p1 = scmp.ne.s32.totalorder %s920_s22, %s916_s21 }
   0x9   : > { %p35_p2 = scmp.eq.s32.totalorder %s924_s23, 0  ;;  %p40_p3 = scmp.ne.s32.totalorder %s916_s21, %s912_s20 }
   0xa   : > { %s1029_s27 = scalar_select %p25_p0, %s920_s22, %s27_s26  }
   0xb   : > { %p1031_p4 = por %p35_p2, %p34_p1  ;;  %p41_p5 = scmp.eq.s32.totalorder %s1016_s4, 0 }
   0xc   : > { %p148_p6 = scmp.eq.s32.totalorder %s1016_s4, 1  ;;  %p634_p7 = scmp.ge.s32.totalorder %s924_s23, 1 }
   0xd   : > { %p1040_p8 = por %p41_p5, %p40_p3  ;;  %p161_p9 = scmp.lt.s32.totalorder %s924_s23, 3 }
   0xe   : > { %p1045_p10 = por %p148_p6, %p34_p1  ;;  %s958_s7 = smov [#allocation5]  }
   0xf   : > { %s1185_s29 = scalar_select %p1040_p8, 1, 0 }
  0x10   : > { %s1186_s30 = scalar_select %p1045_p10, 1, 0 }
  0x11   : > { %p1049_p11 = pnand %p634_p7, %p161_p9  ;;  %s173_s8 = sshll.u32 %s958_s7, 4  ;;  %s174_s8 = int_to_ptr.vmem [resolvable:$true] %s173_s8 }
  0x12   : > { %s813_s9 = scalar_lea.vmem %s174_s8, 512  ;;  %p821_p6 = scmp.lt.s32.totalorder %s174_s8, %s174_s8 }
  0x13   : > { %p695_p12 = pneg %p1049_p11  ;;  %p814_p2 = scmp.ne.s32.totalorder %s174_s8, %s813_s9 }
  0x14   : > { %p822_p8 = scmp.lt.s32.totalorder %s813_s9, %s813_s9 }
  0x15   : > { %p696_p13 = pnand %p695_p12, %p41_p5 }
  0x16   : > { %p823_p10 = por %p822_p8, %p821_p6 }
  0x17   : > { %p804_p0 = pneg %p696_p13 }
  0x19   : > { %p816_p3 = pnand %p814_p2, %p804_p0 }
  0x1b   : > { %p817_p1 = pneg %p816_p3 }
  0x1d   : > { %p824_p7 = pnand %p823_p10, %p817_p1 }
  0x1f   : > { %827 = shalt.err (!%p824_p7)
}
  0x20   : > { %s959_s10 = smov 128   ;;  %s960_s11 = smov 8  }
  0x21   : > { %698 = dma.hbm_to_vmem [thread:$0]  (!%p696_p13), %s1178_s1, 512, %s174_s8, [#allocation6], %s959_s10, %s959_s10, %s960_s11  }
  0x22   : > { %p636_p9 = scmp.ge.s32.totalorder %s924_s23, 2 }
  0x24   : > { %192 = sbr.rel (%p636_p9) target bundleno = 73 (0x49), region = 32 }
  0x29   : > { %195 = sbr.rel (!%p1031_p4) target bundleno = 73 (0x49), region = 36  ;;  %s196_s14 = sand.u32 (%p1031_p4), 1, %s920_s22  }
  0x2a   : > { %s638_s15 = sshll.u32 (%p1031_p4), %s924_s23, 1  ;;  %s637_s16 = sshll.u32 (%p1031_p4), %s196_s14, 4 }
  0x2b   : > { %s202_s17 = ssub.s32 (%p1031_p4), 3, %s638_s15  ;;  %s1068_s20 = scalar_lea.sflag (%p1031_p4), [#allocation4], %s196_s14 }
  0x2c   : > { %p203_p8 = scmp.lt.s32.totalorder (%p1031_p4), %s202_s17, 2  ;;  %s200_s25 = scalar_lea.vmem (%p1031_p4), [#allocation3], %s637_s16 }
  0x2e   : > { %s1195_s17 = smov (!%p203_p8, %s202_s17), 2 }
  0x2f   : > { %s1065_s18 = sshll.u32 %s1195_s17, 7 }
  0x30   : > { %s207_s19 = ssub.s32 256, %s1065_s18 }
  0x31   : > { %208 = vsyncadd %s1068_s20, %s207_s19  ;;  %p640_p4 = scmp.ne.s32.totalorder %s1065_s18, 0  ;;  %s669_s26 = sshll.u32 %s924_s23, 8 }
  0x32   : > { %s1076_s8 = scalar_lea.hbm %s1177_s0, %s669_s26  ;;  %s213_s9 = sshll.u32 %s200_s25, 4  ;;  %s1078_s9 = int_to_ptr.vmem [resolvable:$true] %s213_s9 }
  0x33   : > { %s828_s10 = scalar_lea.hbm %s1076_s8, %s1065_s18  ;;  %s832_s23 = scalar_lea.hbm %s1177_s0, 384 }
  0x34   : > { %p829_p10 = scmp.ne.s32.totalorder %s1076_s8, %s828_s10  ;;  %p833_p0 = scmp.lt.s32.totalorder %s1076_s8, %s1177_s0 }
  0x35   : > { %p834_p2 = scmp.lt.s32.totalorder %s832_s23, %s828_s10 }
  0x36   : > { %p830_p12 = pnand %p829_p10, %p640_p4 }
  0x37   : > { %p835_p3 = por %p834_p2, %p833_p0 }
  0x38   : > { %p831_p13 = pneg %p830_p12 }
  0x3a   : > { %p836_p1 = pnand %p835_p3, %p831_p13 }
  0x3c   : > { %839 = shalt.err (!%p836_p1)
}
  0x3d   : > { %s840_s15 = scalar_lea.vmem %s1078_s9, %s1065_s18  ;;  %s961_s16 = smov [#allocation3]  }
  0x3e   : > { %p841_p6 = scmp.ne.s32.totalorder %s1078_s9, %s840_s15  ;;  %s844_s17 = sshll.u32 %s961_s16, 4  ;;  %s845_s17 = int_to_ptr.vmem [resolvable:$false] %s844_s17 }
  0x3f   : > { %s846_s19 = scalar_lea.vmem %s845_s17, 512  ;;  %p847_p8 = scmp.lt.s32.totalorder %s1078_s9, %s845_s17 }
  0x40   : > { %p842_p7 = pnand %p841_p6, %p640_p4  ;;  %p848_p10 = scmp.lt.s32.totalorder %s846_s19, %s840_s15 }
  0x42   : > { %p843_p9 = pneg %p842_p7  ;;  %p849_p12 = por %p848_p10, %p847_p8 }
  0x44   : > { %p850_p0 = pnand %p849_p12, %p843_p9 }
  0x46   : > { %853 = shalt.err (!%p850_p0)
}
  0x47   : > { %s962_s25 = smov 128   ;;  %s963_s26 = smov 8  }
  0x48   : > { %219 = dma.hbm_to_vmem [thread:$0]  (%p640_p4), %s1076_s8, %s1065_s18, %s1078_s9, %s1068_s20, %s962_s25, %s962_s25, %s963_s26  }
  0x49 PF: > { %225 = sbr.rel (%p1049_p11) target bundleno = 478 (0x1de), region = 40  ;;  %s227_s28 = sand.u32 (!%p1049_p11), 1, %s916_s21  }
  0x4a   : > { %s1107_s7 = sshll.u32 (!%p1049_p11), %s227_s28, 4  ;;  %s228_s10 = scalar_lea.sflag (!%p1049_p11), [#allocation4], %s227_s28 }
  0x4b   : > { %s231_s11 = scalar_lea.vmem (!%p1049_p11), [#allocation3], %s1107_s7  ;;  %p1188_p13 = scmp.ne.s32.totalorder (!%p1049_p11), %s1185_s29, 0 }
  0x4e   : > { %903 = dma.done.wait (%p1188_p13), %s228_s10, 256  }
  0x4f   : > { %905 = vsyncadd (%p1188_p13), %s228_s10, 4294967040 }
  0x50   : > { %907 = dma.done.wait (%p41_p5), [#allocation6], 512  }
  0x51   : > { %909 = vsyncadd (%p41_p5), [#allocation6], 4294966784  ;;  %vm286_vm0 = vcmask 261120   ;;  %v274_v0 = vld [vmem:[#allocation5 + $0x18] sm:$0xff]  ;;  %v273_v1 = vld [vmem:[#allocation5 + $0x10] sm:$0xff]  ;;  %s277_s8 = sld [smem:[#allocation2]] }
  0x52   : > { %679 = vmatprep.subr.mxu0 %v274_v0  ;;  %v278_v2 = vld [vmem:[%s231_s11] sm:$0xff]  ;;  %v272_v3 = vld [vmem:[#allocation5 + $0x8] sm:$0xff]  ;;  %vm389_vm1 = vcmask 7168   ;;  %s1129_s9 = scalar_lea.vmem [#allocation7], %s1107_s7   ;;  %p1189_p5 = scmp.ne.s32.totalorder %s1186_s30, 0 }
  0x53   : > { %680 = vmatpush3.msra.mxu0 %v274_v0  ;;  %687 = vmatprep.mubr.msk.f32.mxu0 %vm286_vm0, %v278_v2  ;;  %v271_v4 = vld [vmem:[#allocation5] sm:$0xff]  ;;  %v279_v5 = vld [vmem:[%s231_s11 + $0x8] sm:$0xff]  ;;  %s653_s12 = sshll.u32 (%p1189_p5), %s1016_s4, 1  ;;  %s670_s23 = sshll.u32 (%p1189_p5), %s1016_s4, 4 }
  0x54   : > { %681 = vmatprep.subr.mxu0 %v273_v1  ;;  %v648_v6 = vld [vmem:[%s1179_s2] ss:$0 sm:$0xff]  ;;  %s400_s13 = ssub.s32 (%p1189_p5), 3, %s653_s12  ;;  %s1140_s16 = scalar_lea.vmem (%p1189_p5), %s1182_s5, %s670_s23  }
  0x55   : > { %682 = vmatpush3.msra.mxu0 %v273_v1  ;;  %v651_v15 = vld [vmem:[%s1180_s3] ss:$0 sm:$0xff]  ;;  %p401_p11 = scmp.lt.s32.totalorder (%p1189_p5), %s400_s13, 2 }
  0x56   : > { %683 = vmatprep.subr.mxu0 %v272_v3 }
  0x57   : > { %684 = vmatpush3.msra.mxu0 %v272_v3  ;;  %v386_v20 = vstv %s277_s8 }
  0x58   : > { %685 = vmatprep.subr.mxu0 %v271_v4 }
  0x59   : > { %686 = vmatpush3.msra.mxu0 %v271_v4 }
  0x5a   : > { %688 = vmatmul.mubr.msk.f32.vlgmr.msra.gmra.mxu0 %vm286_vm0, %v279_v5 }
 0x11a   : > { %v689_v7 = vpop.f32.mrf.mxu0 }
 0x11b   : > { %v365_v8 = vadd.f32 %v689_v7, %v648_v6 }
 0x11c   : > { %v359_v9 = vpop.f32.mrf.mxu0 }
 0x11d   : > { %v369_v10 = vmul.f32 0.01, %v365_v8  ;;  %v360_v11 = vadd.f32 %v648_v6, %v359_v9 }
 0x11f   : > { %v368_v12 = vmul.f32 0.01, %v360_v11  ;;  %v371_v13 = vmax.f32 %v365_v8, %v369_v10 }
 0x121   : > { %v370_v14 = vmax.f32 %v360_v11, %v368_v12  ;;  %v379_v18 = vmul.f32 %v651_v15, %v371_v13 }
 0x123   : > { %v378_v16 = vmul.f32 %v651_v15, %v370_v14  ;;  %v383_v19 = vsel %vm286_vm0, %v379_v18, 0.0 }
 0x125   : > { %v380_v17 = vsel %vm286_vm0, %v378_v16, 0.0 }
 0x126   : > { %381 = vadd.xlane.f32.xlu0 %v380_v17 }
 0x12a   : > { %384 = vadd.xlane.f32.xlu0 %v383_v19 }
 0x1af   : > { %v382_v21 = vpop.xlane.xlu0 %381 }
 0x1b0   : > { %v387_v22 = vadd.f32 %v386_v20, %v382_v21 }
 0x1b2   : > { %390 = vst.msk [vmem:[%s1129_s9] sm:$0xff] %vm389_vm1, %v387_v22  ;;  %398 = sbr.rel (!%p1189_p5) target bundleno = 478 (0x1de), region = 52 }
 0x1b3   : > { %v385_v23 = vpop.xlane.xlu0 %384 }
 0x1b4   : > { %v388_v24 = vadd.f32 %v386_v20, %v385_v23 }
 0x1b6   : > { %391 = vst.msk [vmem:[%s1129_s9 + $0x8] sm:$0xff] %vm389_vm1, %v388_v24 }
 0x1b7   : > { %s1197_s13 = smov (!%p401_p11, %s400_s13), 2 }
 0x1b8   : > { %s654_s17 = sshll.u32 %s1197_s13, 7 }
 0x1b9   : > { %p657_p4 = scmp.eq.s32.totalorder %s654_s17, 0 }
 0x1ba   : > { %s1146_s30 = sshrl.u32 (!%p657_p4), %s1197_s13, 1 }
 0x1bb   : > { %409 = sbr.rel (%p657_p4) target bundleno = 478 (0x1de), region = 56  ;;  %p658_p2 = scmp.le.s32.totalorder (!%p657_p4), %s1146_s30, 0 }
 0x1c0   : > { %577 = sbr.rel (%p658_p2) target bundleno = 461 (0x1cd), region = 138  ;;  %s926_s4 = smov (!%p658_p2), %s1140_s16  }
 0x1c1   : > { %s930_s19 = smov (!%p658_p2), %s1129_s9   ;;  %s934_s25 = smov (!%p658_p2), 0  }
 0x1c2   : > { %s938_s26 = smov (!%p658_p2), 0  }
 0x1c5 LB: >> { %v474_v25 = vld [vmem:[%s932_s19] sm:$0xff]  ;;  %v476_v26 = vld [vmem:[%s932_s19 + $0x8] sm:$0xff]  ;;  %s478_s28 = sadd.s32 1, %s936_s25  ;;  %s468_s26 = sadd.s32 1, %s940_s26   ;;  %s940_s26 = sphi %s938_s26, %s468_s26   ;;  %s936_s25 = sphi %s934_s25, %s935_s25   ;;  %s932_s19 = sphi %s930_s19, %s483_s19   ;;  %s928_s4 = sphi %s926_s4, %s484_s4  }
 0x1c6   : >> { %475 = vst [vmem:[%s928_s4] sm:$0xff] %v474_v25  ;;  %477 = vst [vmem:[%s928_s4 + $0x8] sm:$0xff] %v476_v26  ;;  %p479_p3 = scmp.ge.s32.totalorder %s478_s28, %s1146_s30  ;;  %p467_p1 = scmp.ge.s32.totalorder %s468_s26, %s1146_s30 }
 0x1c8   : >> { %s1199_s28 = smov (%p479_p3, %s478_s28), 0  ;;  %470 = sbr.rel (!%p467_p1) target bundleno = 453 (0x1c5), region = 144 }
 0x1c9   : >> { %s659_s7 = sshll.u32 %s1199_s28, 4  ;;  %s935_s25 = smov %s1199_s28  }
 0x1ca   : >> { %s483_s19 = scalar_lea.vmem %s1129_s9, %s659_s7 [#allocation7]   ;;  %s484_s4 = scalar_lea.vmem %s1140_s16, %s659_s7  }
 0x1cd PF: > { %s1156_s10 = sand.u32 1, %s1197_s13   ;;  %s671_s11 = sshll.u32 %s1146_s30, 4 }
 0x1ce   : > { %s489_s29 = scalar_lea.vmem %s1129_s9, %s671_s11 [#allocation7]   ;;  %s491_s6 = scalar_lea.vmem %s1140_s16, %s671_s11  }
 0x1cf   : > { %p664_p6 = scmp.le.s32.totalorder %s1156_s10, 0 }
 0x1d0   : > { %s942_s18 = smov (!%p664_p6), %s491_s6   ;;  %s946_s20 = smov (!%p664_p6), %s489_s29  }
 0x1d1   : > { %591 = sbr.rel (%p664_p6) target bundleno = 478 (0x1de), region = 149  ;;  %s950_s8 = smov (!%p664_p6), 0  }
 0x1d2   : > { %s954_s12 = smov (!%p664_p6), 0  }
 0x1d6 LB: >> { %v501_v27 = vld [vmem:[%s948_s20] sm:$0xff]  ;;  %s503_s23 = sadd.s32 1, %s952_s8  ;;  %s495_s12 = sadd.s32 1, %s956_s12   ;;  %s956_s12 = sphi %s954_s12, %s495_s12   ;;  %s952_s8 = sphi %s950_s8, %s951_s8   ;;  %s948_s20 = sphi %s946_s20, %s508_s20   ;;  %s944_s18 = sphi %s942_s18, %s509_s18  }
 0x1d7   : >> { %502 = vst [vmem:[%s944_s18] sm:$0xff] %v501_v27  ;;  %p504_p7 = scmp.ge.s32.totalorder %s503_s23, %s1156_s10  ;;  %p494_p9 = scmp.ge.s32.totalorder %s495_s12, %s1156_s10 }
 0x1d9   : >> { %s1201_s23 = smov (%p504_p7, %s503_s23), 0  ;;  %497 = sbr.rel (!%p494_p9) target bundleno = 470 (0x1d6), region = 155 }
 0x1da   : >> { %s665_s9 = sshll.u32 %s1201_s23, 3  ;;  %s951_s8 = smov %s1201_s23  }
 0x1db   : >> { %s508_s20 = scalar_lea.vmem %s489_s29, %s665_s9 [#allocation7]   ;;  %s509_s18 = scalar_lea.vmem %s491_s6, %s665_s9  }
 0x1de PF: > { %p17_p8 = scmp.ge.s32.totalorder %s1019_s24, 4   ;;  %s1190_s20 = smov %s916_s21 }
 0x1df   : > { %s1191_s21 = smov %s920_s22  ;;  %s1192_s22 = smov %s1029_s27 }
 0x1e0   : > { %s1193_s23 = smov %s1019_s24  ;;  %19 = sbr.rel (!%p17_p8) target bundleno = 6 (0x6), region = 166 }
 0x1e5   :  { %525 = vsyncpa [#allocation4], 1 }
 0x1e6   :  { %527 = vsyncpa [#allocation4 + $0x1], 1 }
 0x1e7   :  { %528 = vsyncpa [#allocation6], 1 }

</bundles_post_ra>
